<compile_context>
chip_gen: v7x
topology: tpu7x:2x2x1
jax: 0.10.0
libtpu: 0.0.40
codegen_flags: <defaults>
</compile_context>

<pallas_src>
import jax
import jax.numpy as jnp
from jax.experimental import pallas as pl
from jax.experimental.pallas import tpu as pltpu

HIDDEN = 128
LANE = 128          # lane-dense padded output width
MAX_TILE_B = 256    # rows per grid step once batches get large


def _round_up(n, m):
    return ((n + m - 1) // m) * m


def ddqn_kernel(x_ref, w1_ref, b1_ref, wh_ref, bh_ref, w2_ref, b2_ref, out_ref):
    # shared trunk: Linear + ReLU  -> (TILE_B, 128), f32
    x = x_ref[...]                                                   # bf16
    z = jnp.dot(x, w1_ref[...], preferred_element_type=jnp.float32) + b1_ref[...]
    z = jnp.maximum(z, 0.0)

    # fused hidden layer of value+advantage streams: [hv | ha] -> (TILE_B, 256)
    h = jnp.dot(z.astype(jnp.bfloat16), wh_ref[...],
                preferred_element_type=jnp.float32) + bh_ref[...]
    h = jnp.maximum(h, 0.0)

    # fused output layer (value broadcast + advantage row-sum folded into w2):
    # lane-dense full-width unmasked store; columns documented at file top.
    out_ref[...] = jnp.dot(h.astype(jnp.bfloat16), w2_ref[...],
                           preferred_element_type=jnp.float32) + b2_ref[...]


def init_params(key, num_inputs, num_actions):
    """Deterministic init mimicking nn.Linear's U(-1/sqrt(fan_in), 1/sqrt(fan_in)).
    Weights stored (in, out) == transpose of PyTorch layout; biases (1, out)."""
    def linear(k, fan_in, fan_out):
        kw, kb = jax.random.split(k)
        bound = 1.0 / jnp.sqrt(jnp.float32(fan_in))
        w = jax.random.uniform(kw, (fan_in, fan_out), jnp.float32, -bound, bound)
        b = jax.random.uniform(kb, (1, fan_out), jnp.float32, -bound, bound)
        return w, b

    ks = jax.random.split(key, 5)
    w1, b1 = linear(ks[0], num_inputs, HIDDEN)
    wv1, bv1 = linear(ks[1], HIDDEN, HIDDEN)
    wv2, bv2 = linear(ks[2], HIDDEN, 1)
    wa1, ba1 = linear(ks[3], HIDDEN, HIDDEN)
    wa2, ba2 = linear(ks[4], HIDDEN, num_actions)
    return dict(w1=w1, b1=b1, wv1=wv1, bv1=bv1, wv2=wv2, bv2=bv2,
                wa1=wa1, ba1=ba1, wa2=wa2, ba2=ba2)


def fuse_params(p):
    """Host-side one-time fusion into 3 (bf16 weight, f32 bias) pairs."""
    A = p["wa2"].shape[1]
    assert A + 2 <= LANE, "num_actions (+ sum column) must fit in 128 lanes"

    # hidden layer of both streams: [Wv1 | Wa1]
    wh = jnp.concatenate([p["wv1"], p["wa1"]], axis=1)               # (128, 256)
    bh = jnp.concatenate([p["bv1"], p["ba1"]], axis=1)               # (1, 256)

    # output layer, zero-padded to 128 lanes:
    #   col 0        <- Wv2                       (v)
    #   cols 1..1+A  <- Wv2 replicated + Wa2      (v + a)
    #   col 1+A      <- Wa2 @ ones(A)             (row-sum of a)
    w2 = jnp.zeros((2 * HIDDEN, LANE), jnp.float32)
    w2 = w2.at[:HIDDEN, 0:1].set(p["wv2"])
    w2 = w2.at[:HIDDEN, 1:1 + A].set(jnp.broadcast_to(p["wv2"], (HIDDEN, A)))
    w2 = w2.at[HIDDEN:, 1:1 + A].set(p["wa2"])
    w2 = w2.at[HIDDEN:, 1 + A].set(jnp.sum(p["wa2"], axis=1))

    b2 = jnp.zeros((1, LANE), jnp.float32)
    b2 = b2.at[:, 0:1].set(p["bv2"])
    b2 = b2.at[:, 1:1 + A].set(p["bv2"] + p["ba2"])
    b2 = b2.at[:, 1 + A].set(jnp.sum(p["ba2"]))

    return dict(w1=p["w1"].astype(jnp.bfloat16), b1=p["b1"],
                wh=wh.astype(jnp.bfloat16), bh=bh,
                w2=w2.astype(jnp.bfloat16), b2=b2,
                num_actions=A)


def ddqn_forward(x, fused):
    """x: (B, num_inputs) float32. fused: output of fuse_params(). Returns (B, A)."""
    B, num_inputs = x.shape
    A = fused["num_actions"]

    # Pad B to full f32 sublane tiles; tile at 256 rows once batches are large.
    tile_b = min(MAX_TILE_B, _round_up(B, 8))
    b_pad = _round_up(B, tile_b)
    x_p = jnp.pad(x, ((0, b_pad - B), (0, 0))).astype(jnp.bfloat16)

    const = lambda i: (0, 0)   # weights resident across the (parallel) B grid

    out = pl.pallas_call(
        ddqn_kernel,
        out_shape=jax.ShapeDtypeStruct((b_pad, LANE), jnp.float32),
        grid_spec=pltpu.PrefetchScalarGridSpec(
            num_scalar_prefetch=0,
            grid=(b_pad // tile_b,),
            in_specs=[
                pl.BlockSpec((tile_b, num_inputs), lambda i: (i, 0)),
                pl.BlockSpec((num_inputs, HIDDEN), const),
                pl.BlockSpec((1, HIDDEN), const),
                pl.BlockSpec((HIDDEN, 2 * HIDDEN), const),
                pl.BlockSpec((1, 2 * HIDDEN), const),
                pl.BlockSpec((2 * HIDDEN, LANE), const),
                pl.BlockSpec((1, LANE), const),
            ],
            out_specs=pl.BlockSpec((tile_b, LANE), lambda i: (i, 0)),
        ),
        compiler_params=pltpu.CompilerParams(
            dimension_semantics=("parallel",)),
    )(x_p, fused["w1"], fused["b1"], fused["wh"], fused["bh"],
      fused["w2"], fused["b2"])

    # GLOBAL mean over batch AND actions (exactly torch's advantage.mean()),
    # done in the wrapper so the kernel's B axis is embarrassingly parallel.
    # Only the first B rows count (padded rows carry bias-driven garbage).
    a_mean = jnp.sum(out[:B, 1 + A]) / jnp.float32(B * A)
    return out[:B, 1:1 + A] - a_mean


def ddqn_reference(x, p):
    """Pure-JAX f32 reference of the original module's forward (unfused params)."""
    z = jnp.maximum(x @ p["w1"] + p["b1"], 0.0)
    v = jnp.maximum(z @ p["wv1"] + p["bv1"], 0.0) @ p["wv2"] + p["bv2"]
    a = jnp.maximum(z @ p["wa1"] + p["ba1"], 0.0) @ p["wa2"] + p["ba2"]
    return v + a - jnp.mean(a)


if __name__ == "__main__":
    num_inputs = 16     # small state vector
    num_actions = 8
    batch = 2

    key = jax.random.PRNGKey(0)
    k_x, k_p = jax.random.split(key)
    x = jax.random.normal(k_x, (batch, num_inputs), jnp.float32)
    params = init_params(k_p, num_inputs, num_actions)
    fused = fuse_params(params)

    out = jax.block_until_ready(ddqn_forward(x, fused))
    ref = ddqn_reference(x, params)

    assert out.shape == (batch, num_actions), out.shape
    # Tolerance loosened vs. the f32 reference because weights/activations feed
    # the MXU in bf16 (accumulation stays f32).
    assert jnp.allclose(out, ref, atol=5e-2, rtol=5e-2), (out, ref)

    print("KERNEL_OK")
</pallas_src>

<mosaic_0001>
module attributes {stable_mosaic.version = 11 : i64} {
  func.func @ddqn_kernel(%arg0: i32, %arg1: memref<8x16xbf16, #tpu.memory_space<vmem>>, %arg2: memref<16x128xbf16, #tpu.memory_space<vmem>>, %arg3: memref<1x128xf32, #tpu.memory_space<vmem>>, %arg4: memref<128x256xbf16, #tpu.memory_space<vmem>>, %arg5: memref<1x256xf32, #tpu.memory_space<vmem>>, %arg6: memref<256x128xbf16, #tpu.memory_space<vmem>>, %arg7: memref<1x128xf32, #tpu.memory_space<vmem>>, %arg8: memref<8x128xf32, #tpu.memory_space<vmem>>) attributes {dimension_semantics = [#tpu.dimension_semantics<parallel>], iteration_bounds = array<i64: 1>, scalar_prefetch = 0 : i64, scratch_operands = 0 : i64, tpu.core_type = #tpu.core_type<tc>, window_params = [{transform_indices = @transform_0, window_bounds = array<i64: 8, 16>}, {pipeline_mode = #tpu.pipeline_mode<synchronous>, transform_indices = @transform_1, window_bounds = array<i64: 16, 128>}, {pipeline_mode = #tpu.pipeline_mode<synchronous>, transform_indices = @transform_2, window_bounds = array<i64: 1, 128>}, {pipeline_mode = #tpu.pipeline_mode<synchronous>, transform_indices = @transform_3, window_bounds = array<i64: 128, 256>}, {pipeline_mode = #tpu.pipeline_mode<synchronous>, transform_indices = @transform_4, window_bounds = array<i64: 1, 256>}, {pipeline_mode = #tpu.pipeline_mode<synchronous>, transform_indices = @transform_5, window_bounds = array<i64: 256, 128>}, {pipeline_mode = #tpu.pipeline_mode<synchronous>, transform_indices = @transform_6, window_bounds = array<i64: 1, 128>}, {transform_indices = @transform_7, window_bounds = array<i64: 8, 128>}]} {
    %c0 = arith.constant 0 : index
    %c0_0 = arith.constant 0 : index
    %0 = vector.load %arg1[%c0, %c0_0] : memref<8x16xbf16, #tpu.memory_space<vmem>>, vector<8x16xbf16>
    %c0_1 = arith.constant 0 : index
    %c0_2 = arith.constant 0 : index
    %1 = vector.load %arg2[%c0_1, %c0_2] : memref<16x128xbf16, #tpu.memory_space<vmem>>, vector<16x128xbf16>
    %cst = arith.constant dense<0.000000e+00> : vector<8x128xf32>
    %2 = tpu.matmul %0, %1, %cst {dimension_numbers = #tpu.dot_dimension_numbers<[1], [0], [0], [1], [0, 0, 1, 1], [], []>} : vector<8x16xbf16>, vector<16x128xbf16>, vector<8x128xf32> -> vector<8x128xf32>
    %c0_3 = arith.constant 0 : index
    %c0_4 = arith.constant 0 : index
    %3 = vector.load %arg3[%c0_3, %c0_4] : memref<1x128xf32, #tpu.memory_space<vmem>>, vector<1x128xf32>
    %4 = vector.broadcast %3 : vector<1x128xf32> to vector<8x128xf32>
    %5 = arith.addf %2, %4 : vector<8x128xf32>
    %cst_5 = arith.constant 0.000000e+00 : f32
    %6 = vector.broadcast %cst_5 : f32 to vector<8x128xf32>
    %7 = arith.maximumf %5, %6 : vector<8x128xf32>
    %8 = arith.truncf %7 : vector<8x128xf32> to vector<8x128xbf16>
    %c0_6 = arith.constant 0 : index
    %c0_7 = arith.constant 0 : index
    %9 = vector.load %arg4[%c0_6, %c0_7] : memref<128x256xbf16, #tpu.memory_space<vmem>>, vector<128x256xbf16>
    %cst_8 = arith.constant dense<0.000000e+00> : vector<8x256xf32>
    %10 = tpu.matmul %8, %9, %cst_8 {dimension_numbers = #tpu.dot_dimension_numbers<[1], [0], [0], [1], [0, 0, 1, 1], [], []>} : vector<8x128xbf16>, vector<128x256xbf16>, vector<8x256xf32> -> vector<8x256xf32>
    %c0_9 = arith.constant 0 : index
    %c0_10 = arith.constant 0 : index
    %11 = vector.load %arg5[%c0_9, %c0_10] : memref<1x256xf32, #tpu.memory_space<vmem>>, vector<1x256xf32>
    %12 = vector.broadcast %11 : vector<1x256xf32> to vector<8x256xf32>
    %13 = arith.addf %10, %12 : vector<8x256xf32>
    %cst_11 = arith.constant 0.000000e+00 : f32
    %14 = vector.broadcast %cst_11 : f32 to vector<8x256xf32>
    %15 = arith.maximumf %13, %14 : vector<8x256xf32>
    %16 = arith.truncf %15 : vector<8x256xf32> to vector<8x256xbf16>
    %c0_12 = arith.constant 0 : index
    %c0_13 = arith.constant 0 : index
    %17 = vector.load %arg6[%c0_12, %c0_13] : memref<256x128xbf16, #tpu.memory_space<vmem>>, vector<256x128xbf16>
    %cst_14 = arith.constant dense<0.000000e+00> : vector<8x128xf32>
    %18 = tpu.matmul %16, %17, %cst_14 {dimension_numbers = #tpu.dot_dimension_numbers<[1], [0], [0], [1], [0, 0, 1, 1], [], []>} : vector<8x256xbf16>, vector<256x128xbf16>, vector<8x128xf32> -> vector<8x128xf32>
    %c0_15 = arith.constant 0 : index
    %c0_16 = arith.constant 0 : index
    %19 = vector.load %arg7[%c0_15, %c0_16] : memref<1x128xf32, #tpu.memory_space<vmem>>, vector<1x128xf32>
    %20 = vector.broadcast %19 : vector<1x128xf32> to vector<8x128xf32>
    %21 = arith.addf %18, %20 : vector<8x128xf32>
    %c0_17 = arith.constant 0 : index
    %c0_18 = arith.constant 0 : index
    %22 = vector.load %arg8[%c0_17, %c0_18] : memref<8x128xf32, #tpu.memory_space<vmem>>, vector<8x128xf32>
    tpu.vector_store %arg8[%c0_17, %c0_18], %21 {strides = array<i32>} : memref<8x128xf32, #tpu.memory_space<vmem>>, vector<8x128xf32>,
    return
  }
  func.func @transform_0(%arg0: i32) -> (i32, i32) {
    %c0_i32 = arith.constant 0 : i32
    %c0_i32_0 = arith.constant 0 : i32
    return %arg0, %c0_i32 : i32, i32
  }
  func.func @transform_1(%arg0: i32) -> (i32, i32) {
    %c0_i32 = arith.constant 0 : i32
    %c0_i32_0 = arith.constant 0 : i32
    %c0_i32_1 = arith.constant 0 : i32
    return %c0_i32, %c0_i32_0 : i32, i32
  }
  func.func @transform_2(%arg0: i32) -> (i32, i32) {
    %c0_i32 = arith.constant 0 : i32
    %c0_i32_0 = arith.constant 0 : i32
    %c0_i32_1 = arith.constant 0 : i32
    return %c0_i32, %c0_i32_0 : i32, i32
  }
  func.func @transform_3(%arg0: i32) -> (i32, i32) {
    %c0_i32 = arith.constant 0 : i32
    %c0_i32_0 = arith.constant 0 : i32
    %c0_i32_1 = arith.constant 0 : i32
    return %c0_i32, %c0_i32_0 : i32, i32
  }
  func.func @transform_4(%arg0: i32) -> (i32, i32) {
    %c0_i32 = arith.constant 0 : i32
    %c0_i32_0 = arith.constant 0 : i32
    %c0_i32_1 = arith.constant 0 : i32
    return %c0_i32, %c0_i32_0 : i32, i32
  }
  func.func @transform_5(%arg0: i32) -> (i32, i32) {
    %c0_i32 = arith.constant 0 : i32
    %c0_i32_0 = arith.constant 0 : i32
    %c0_i32_1 = arith.constant 0 : i32
    return %c0_i32, %c0_i32_0 : i32, i32
  }
  func.func @transform_6(%arg0: i32) -> (i32, i32) {
    %c0_i32 = arith.constant 0 : i32
    %c0_i32_0 = arith.constant 0 : i32
    %c0_i32_1 = arith.constant 0 : i32
    return %c0_i32, %c0_i32_0 : i32, i32
  }
  func.func @transform_7(%arg0: i32) -> (i32, i32) {
    %c0_i32 = arith.constant 0 : i32
    %c0_i32_0 = arith.constant 0 : i32
    return %arg0, %c0_i32 : i32, i32
  }
}

</mosaic_0001>

<bundles_post_ra>
// kernel: tpu_custom_call.1
= control target key start
LH: loop header
LB: loop body
LE: loop exit
PB: predicated region body
PF: predicated region fallthrough
CT: control target
= control target key end

     0   :  { %12 = vsyncpa [#allocation3], 0  ;;  %s853_s0 = inlined_call_operand.hbm [shape: bf16[8,16], index: 0, kind: input, shape index: {}]   ;;  %s854_s1 = inlined_call_operand.hbm [shape: bf16[16,128], index: 1, kind: input, shape index: {}]   ;;  %s855_s2 = inlined_call_operand.vmem [shape: f32[1,128], index: 2, kind: input, shape index: {}]   ;;  %s856_s3 = inlined_call_operand.hbm [shape: bf16[128,256], index: 3, kind: input, shape index: {}]   ;;  %s857_s4 = inlined_call_operand.vmem [shape: f32[1,256], index: 4, kind: input, shape index: {}]   ;;  %s858_s5 = inlined_call_operand.hbm [shape: bf16[256,128], index: 5, kind: input, shape index: {}]   ;;  %s859_s6 = inlined_call_operand.vmem [shape: f32[1,128], index: 6, kind: input, shape index: {}]   ;;  %s860_s7 = inlined_call_operand.hbm [shape: f32[8,128], index: 7, kind: output, shape index: {}]  }
   0x1   :  { %13 = vsyncpa [#allocation6], 0 }
   0x2   :  { %14 = vsyncpa [#allocation9], 0 }
   0x3   :  { %15 = vsyncpa [#allocation4], 0  ;;  %s726_s24 = smov [#allocation5]   ;;  %s608_s28 = scalar_lea.hbm %s854_s1, 128 }
   0x4   :  { %s31_s25 = sshll.u32 %s726_s24, 4  ;;  %p609_p0 = scmp.ne.s32.totalorder %s854_s1, %s608_s28  ;;  %s32_s25 = int_to_ptr.vmem [resolvable:$true] %s31_s25 }
   0x5   :  { %p612_p1 = scmp.lt.u32.totalorder %s608_s28, %s854_s1 }
   0x7   :  { %p614_p2 = pnand %p612_p1, %p609_p0 }
   0x9   :  { %617 = shalt.err (!%p614_p2)
}
   0xa   :  { %s618_s10 = scalar_lea.vmem %s32_s25, 128  ;;  %p623_p4 = scmp.lt.s32.totalorder %s32_s25, %s32_s25 }
   0xb   :  { %p619_p3 = scmp.ne.s32.totalorder %s32_s25, %s618_s10  ;;  %p624_p5 = scmp.lt.s32.totalorder %s618_s10, %s618_s10 }
   0xd   :  { %p625_p6 = por %p624_p5, %p623_p4 }
   0xf   :  { %p626_p7 = pnand %p625_p6, %p619_p3 }
  0x11   :  { %629 = shalt.err (!%p626_p7)
}
  0x12   :  { %s727_s11 = smov 64   ;;  %s728_s12 = smov 4  }
  0x13   :  { %37 = dma.hbm_to_vmem [thread:$0]  %s854_s1, 128, %s32_s25, [#allocation6], %s727_s11, %s727_s11, %s728_s12  }
  0x14   :  { %s729_s15 = smov [#allocation2]   ;;  %s730_s17 = smov [#allocation7]  }
  0x15   :  { %s22_s16 = sshll.u32 %s729_s15, 4  ;;  %s45_s18 = sshll.u32 %s730_s17, 4  ;;  %s23_s16 = int_to_ptr.vmem [resolvable:$true] %s22_s16  ;;  %s46_s18 = int_to_ptr.vmem [resolvable:$true] %s45_s18 }
  0x16   :  { %s630_s21 = scalar_lea.hbm %s853_s0, 64 }
  0x17   :  { %p631_p8 = scmp.ne.s32.totalorder %s853_s0, %s630_s21  ;;  %p634_p9 = scmp.lt.u32.totalorder %s630_s21, %s853_s0 }
  0x19   :  { %p636_p10 = pnand %p634_p9, %p631_p8 }
  0x1b   :  { %639 = shalt.err (!%p636_p10)
}
  0x1c   :  { %s640_s1 = scalar_lea.vmem %s23_s16, 64  ;;  %p645_p12 = scmp.lt.s32.totalorder %s23_s16, %s23_s16 }
  0x1d   :  { %p641_p11 = scmp.ne.s32.totalorder %s23_s16, %s640_s1  ;;  %p646_p13 = scmp.lt.s32.totalorder %s640_s1, %s640_s1 }
  0x1f   :  { %p647_p0 = por %p646_p13, %p645_p12 }
  0x21   :  { %p648_p1 = pnand %p647_p0, %p641_p11 }
  0x23   :  { %651 = shalt.err (!%p648_p1)
}
  0x24   :  { %25 = dma.hbm_to_vmem [thread:$0]  %s853_s0, 64, %s23_s16, [#allocation3]  }
  0x25   :  { %s652_s30 = scalar_lea.hbm %s856_s3, 2048 }
  0x26   :  { %p653_p2 = scmp.ne.s32.totalorder %s856_s3, %s652_s30  ;;  %p656_p3 = scmp.lt.u32.totalorder %s652_s30, %s856_s3 }
  0x28   :  { %p658_p4 = pnand %p656_p3, %p653_p2 }
  0x2a   :  { %661 = shalt.err (!%p658_p4)
}
  0x2b   :  { %s662_s14 = scalar_lea.vmem %s46_s18, 2048  ;;  %p667_p6 = scmp.lt.s32.totalorder %s46_s18, %s46_s18 }
  0x2c   :  { %p663_p5 = scmp.ne.s32.totalorder %s46_s18, %s662_s14  ;;  %p668_p7 = scmp.lt.s32.totalorder %s662_s14, %s662_s14 }
  0x2e   :  { %p669_p8 = por %p668_p7, %p667_p6 }
  0x30   :  { %p670_p9 = pnand %p669_p8, %p663_p5 }
  0x32   :  { %673 = shalt.err (!%p670_p9)
}
  0x33   :  { %s731_s0 = smov 128   ;;  %s732_s15 = smov 8  }
  0x34   :  { %51 = dma.hbm_to_vmem [thread:$0]  %s856_s3, 2048, %s46_s18, [#allocation6], %s731_s0, %s731_s0, %s732_s15  }
  0x35   :  { %s733_s19 = smov [#allocation8]   ;;  %s674_s23 = scalar_lea.hbm %s858_s5, 2048 }
  0x36   :  { %s59_s20 = sshll.u32 %s733_s19, 4  ;;  %p675_p10 = scmp.ne.s32.totalorder %s858_s5, %s674_s23  ;;  %s60_s20 = int_to_ptr.vmem [resolvable:$true] %s59_s20 }
  0x37   :  { %p678_p11 = scmp.lt.u32.totalorder %s674_s23, %s858_s5 }
  0x39   :  { %p680_p12 = pnand %p678_p11, %p675_p10 }
  0x3b   :  { %683 = shalt.err (!%p680_p12)
}
  0x3c   :  { %s684_s27 = scalar_lea.vmem %s60_s20, 2048  ;;  %p689_p0 = scmp.lt.s32.totalorder %s60_s20, %s60_s20 }
  0x3d   :  { %p685_p13 = scmp.ne.s32.totalorder %s60_s20, %s684_s27  ;;  %p690_p1 = scmp.lt.s32.totalorder %s684_s27, %s684_s27 }
  0x3f   :  { %p691_p2 = por %p690_p1, %p689_p0 }
  0x41   :  { %p692_p3 = pnand %p691_p2, %p685_p13 }
  0x43   :  { %695 = shalt.err (!%p692_p3)
}
  0x44   :  { %65 = dma.hbm_to_vmem [thread:$0]  %s858_s5, 2048, %s60_s20, [#allocation9], %s727_s11, %s727_s11, %s728_s12  }
  0x45   :  { %718 = dma.done.wait [#allocation3], 64  }
  0x46   :  { %719 = vsyncadd [#allocation3], 4294967232 }
  0x47   :  { %720 = dma.done.wait [#allocation6], 2176  }
  0x48   :  { %721 = vsyncadd [#allocation6], 4294965120 }
  0x49   :  { %722 = dma.done.wait [#allocation9], 2048  }
  0x4a   :  { %723 = vsyncadd [#allocation9], 4294965248  ;;  %v734_v0 = vmov 0.0   ;;  %vm735_vm0 = vmmov 0   ;;  %v567_v1 = vld [vmem:[#allocation5] sm:$0xff]   ;;  %vm97_vm1 = vcmask 130048   ;;  %v161_v44 = vlaneseq }
  0x4b   :  { %549 = vmatprep.subr.bf16.mxu0 %v734_v0  ;;  %551 = vmatprep.mubr.msk.bf16.mxu0 %vm735_vm0, %v734_v0  ;;  %v81_v2 = vld [vmem:[#allocation2] sm:$0xf]  ;;  %v568_v3 = vld [vmem:[#allocation7 + $0x4] ss:$8 sps:$4 sm:$0xff]   ;;  %v570_v4 = vld [vmem:[#allocation7] ss:$8 sps:$4 sm:$0xff]  }
  0x4c   :  { %550 = vmatpush3.bf16.msra.mxu0 %v567_v1  ;;  %v571_v5 = vld [vmem:[#allocation7 + $0x14] ss:$8 sps:$4 sm:$0xff]   ;;  %251 = vmatprep.subr.bf16.mxu1 %v568_v3  ;;  %v573_v6 = vld [vmem:[#allocation7 + $0x10] ss:$8 sps:$4 sm:$0xff]   ;;  %v574_v7 = vld [vmem:[#allocation7 + $0x24] ss:$8 sps:$4 sm:$0xff]  }
  0x4d   :  { %252 = vmatpush1.bf16.msra.mxu1 %v570_v4  ;;  %v576_v8 = vld [vmem:[#allocation7 + $0x20] ss:$8 sps:$4 sm:$0xff]   ;;  %v577_v9 = vld [vmem:[#allocation7 + $0x34] ss:$8 sps:$4 sm:$0xff]   ;;  %v579_v10 = vld [vmem:[#allocation7 + $0x30] ss:$8 sps:$4 sm:$0xff]  }
  0x4e   :  { %253 = vmatprep.subr.bf16.mxu1 %v571_v5  ;;  %v580_v11 = vld [vmem:[#allocation7 + $0x44] ss:$8 sps:$4 sm:$0xff]   ;;  %v582_v12 = vld [vmem:[#allocation7 + $0x40] ss:$8 sps:$4 sm:$0xff]   ;;  %v583_v13 = vld [vmem:[#allocation7 + $0x54] ss:$8 sps:$4 sm:$0xff]  }
  0x4f   :  { %552 = vmatmul.mubr.msk.bf16.vlgmr.msra.gmra.mrb[0].mxu0 %vm97_vm1, %v81_v2  ;;  %v585_v14 = vld [vmem:[#allocation7 + $0x50] ss:$8 sps:$4 sm:$0xff]   ;;  %v586_v15 = vld [vmem:[#allocation7 + $0x64] ss:$8 sps:$4 sm:$0xff]   ;;  %v588_v16 = vld [vmem:[#allocation7 + $0x60] ss:$8 sps:$4 sm:$0xff]  }
  0x50   :  { %v589_v17 = vld [vmem:[#allocation7 + $0x74] ss:$8 sps:$4 sm:$0xff]   ;;  %v591_v18 = vld [vmem:[#allocation7 + $0x70] ss:$8 sps:$4 sm:$0xff]   ;;  %v736_v19 = vmov 0   ;;  %v592_v20 = vld [vmem:[#allocation8 + $0x40] sm:$0xff]  }
  0x51   :  { %254 = vmatpush1.bf16.msra.mxu1 %v573_v6  ;;  %283 = vmatprep.mubr.bf16.mxu1 %v736_v19  ;;  %v593_v21 = vld [vmem:[#allocation8] sm:$0xff]   ;;  %v594_v22 = vld [vmem:[#allocation8 + $0x48] sm:$0xff]   ;;  %v596_v24 = vld [vmem:[#allocation8 + $0x50] sm:$0xff]   ;;  %v162_v45 = vshrl.u32 %v161_v44, 7 }
  0x52   :  { %255 = vmatprep.subr.bf16.mxu1 %v574_v7  ;;  %527 = vmatprep.subr.bf16.mxu0 %v592_v20  ;;  %v595_v23 = vld [vmem:[#allocation8 + $0x8] sm:$0xff]   ;;  %v597_v25 = vld [vmem:[#allocation8 + $0x10] sm:$0xff]   ;;  %v598_v26 = vld [vmem:[#allocation8 + $0x58] sm:$0xff]  }
  0x53   :  { %528 = vmatpush3.bf16.msra.mxu0 %v593_v21  ;;  %v599_v27 = vld [vmem:[#allocation8 + $0x18] sm:$0xff]   ;;  %v600_v28 = vld [vmem:[#allocation8 + $0x60] sm:$0xff]   ;;  %v602_v30 = vld [vmem:[#allocation8 + $0x68] sm:$0xff]   ;;  %v163_v46 = vsub.s32 0, %v162_v45  ;;  %v167_v48 = vsub.s32 1, %v162_v45 }
  0x54   :  { %529 = vmatprep.subr.bf16.mxu0 %v594_v22  ;;  %v601_v29 = vld [vmem:[#allocation8 + $0x20] sm:$0xff]   ;;  %v603_v31 = vld [vmem:[#allocation8 + $0x28] sm:$0xff]   ;;  %v489_v32 = vld [vmem:[%s855_s2] ss:$0 sm:$0xff] }
  0x55   :  { %256 = vmatpush1.bf16.msra.mxu1 %v576_v8  ;;  %v604_v40 = vld [vmem:[#allocation8 + $0x70] sm:$0xff]   ;;  %v606_v42 = vld [vmem:[#allocation8 + $0x78] sm:$0xff]  }
  0x56   :  { %257 = vmatprep.subr.bf16.mxu1 %v577_v9  ;;  %v605_v41 = vld [vmem:[#allocation8 + $0x30] sm:$0xff]   ;;  %v607_v43 = vld [vmem:[#allocation8 + $0x38] sm:$0xff]  }
  0x57   :  { %530 = vmatpush3.bf16.msra.mxu0 %v595_v23  ;;  %v159_v47 = vld [vmem:[%s857_s4] sm:$0x3]  ;;  %s737_s4 = smov [#allocation10]  }
  0x58   :  { %531 = vmatprep.subr.bf16.mxu0 %v596_v24  ;;  %v164_v49 = vrot.slane %v159_v47, %v163_v46  ;;  %v168_v50 = vrot.slane %v159_v47, %v167_v48  ;;  %v508_v62 = vld [vmem:[%s859_s6] ss:$0 sm:$0xff]  ;;  %s478_s30 = sshll.u32 %s737_s4, 4  ;;  %s479_s30 = int_to_ptr.vmem [resolvable:$true] %s478_s30 }
  0x59   :  { %258 = vmatpush1.bf16.msra.mxu1 %v579_v10  ;;  %s696_s8 = scalar_lea.vmem %s479_s30, 128  ;;  %p701_p5 = scmp.lt.s32.totalorder %s479_s30, %s479_s30 }
  0x5a   :  { %259 = vmatprep.subr.bf16.mxu1 %v580_v11  ;;  %p697_p4 = scmp.ne.s32.totalorder %s479_s30, %s696_s8  ;;  %p702_p6 = scmp.lt.s32.totalorder %s696_s8, %s696_s8 }
  0x5b   :  { %532 = vmatpush3.bf16.msra.mxu0 %v597_v25 }
  0x5c   :  { %533 = vmatprep.subr.bf16.mxu0 %v598_v26  ;;  %p703_p7 = por %p702_p6, %p701_p5 }
  0x5d   :  { %260 = vmatpush1.bf16.msra.mxu1 %v582_v12 }
  0x5e   :  { %261 = vmatprep.subr.bf16.mxu1 %v583_v13  ;;  %p704_p8 = pnand %p703_p7, %p697_p4 }
  0x5f   :  { %534 = vmatpush3.bf16.msra.mxu0 %v599_v27 }
  0x60   :  { %535 = vmatprep.subr.bf16.mxu0 %v600_v28 }
  0x61   :  { %262 = vmatpush1.bf16.msra.mxu1 %v585_v14 }
  0x62   :  { %263 = vmatprep.subr.bf16.mxu1 %v586_v15 }
  0x63   :  { %536 = vmatpush3.bf16.msra.mxu0 %v601_v29 }
  0x64   :  { %537 = vmatprep.subr.bf16.mxu0 %v602_v30 }
  0x65   :  { %264 = vmatpush1.bf16.msra.mxu1 %v588_v16 }
  0x66   :  { %265 = vmatprep.subr.bf16.mxu1 %v589_v17 }
  0x67   :  { %538 = vmatpush3.bf16.msra.mxu0 %v603_v31 }
  0x68   :  { %539 = vmatprep.subr.bf16.mxu0 %v604_v40 }
  0x69   :  { %266 = vmatpush1.bf16.msra.mxu1 %v591_v18 }
  0x6b   :  { %540 = vmatpush3.bf16.msra.mxu0 %v605_v41 }
  0x6c   :  { %541 = vmatprep.subr.bf16.mxu0 %v606_v42 }
  0x6f   :  { %542 = vmatpush3.bf16.msra.mxu0 %v607_v43 }
 0x122   :  { %v135_v33 = vpop.f32.mrb[0].mxu0 }
 0x123   :  { %v136_v34 = vadd.f32 %v489_v32, %v135_v33  ;;  %v553_v35 = vpop.f32.mrb[1].mxu0 }
 0x124   :  { %v138_v36 = vpop.f32.mrb[2].mxu0 }
 0x125   :  { %v141_v37 = vmax.f32 %v136_v34, 0.0  ;;  %v554_v38 = vpop.f32.mrb[3].mxu0 }
 0x127   :  { %v142_v39 = vpack.c.bf16 %v141_v37, %v141_v37 }
 0x129   :  { %284 = vmatmul.mubr.bf16.vlgmr.msra.gmra.mrb[0].mxu1 %v142_v39 }
 0x1fc   :  { %v285_v51 = vpop.f32.mrb[0].mxu1 }
 0x1fd   :  { %v286_v52 = vadd.f32 %v285_v51, %v164_v49  ;;  %v287_v53 = vpop.f32.mrb[1].mxu1 }
 0x1fe   :  { %v288_v54 = vadd.f32 %v287_v53, %v168_v50  ;;  %v289_v55 = vpop.f32.mrb[2].mxu1 }
 0x1ff   :  { %v292_v56 = vmax.f32 %v286_v52, 0.0  ;;  %v290_v57 = vpop.f32.mrb[3].mxu1 }
 0x200   :  { %v293_v58 = vmax.f32 %v288_v54, 0.0 }
 0x201   :  { %v294_v60 = vpack.c.bf16 %v292_v56, %v292_v56 }
 0x202   :  { %v295_v59 = vpack.c.bf16 %v293_v58, %v293_v58 }
 0x204   :  { %463 = vmatprep.mubr.bf16.mxu0 %v295_v59 }
 0x205   :  { %464 = vmatmul.mubr.bf16.vlgmr.msra.gmra.mrb[4].mxu0 %v294_v60 }
 0x2d8   :  { %v543_v61 = vpop.f32.mrb[4].mxu0 }
 0x2d9   :  { %v544_v63 = vpop.f32.mrb[5].mxu0 }
 0x2da   :  { %v545_v0 = vadd.f32 %v544_v63, %v543_v61  ;;  %v546_v1 = vpop.f32.mrb[6].mxu0 }
 0x2db   :  { %v547_v2 = vpop.f32.mrb[7].mxu0 }
 0x2dc   :  { %v466_v3 = vadd.f32 %v545_v0, %v508_v62 }
 0x2de   :  { %471 = vst [vmem:[#allocation10] sm:$0xff] %v466_v3 }
 0x2df   :  { %707 = shalt.err (!%p704_p8)
}
 0x2e0   :  { %s708_s6 = scalar_lea.hbm %s860_s7, 128 }
 0x2e1   :  { %p709_p9 = scmp.ne.s32.totalorder %s860_s7, %s708_s6  ;;  %p712_p10 = scmp.lt.u32.totalorder %s708_s6, %s860_s7 }
 0x2e3   :  { %p714_p11 = pnand %p712_p10, %p709_p9 }
 0x2e5   :  { %717 = shalt.err (!%p714_p11)
}
 0x2e6   :  { %481 = dma.vmem_to_hbm [thread:$0]  %s479_s30, 128, %s860_s7, [#allocation4]  }
 0x2e7   :  { %724 = dma.done.wait [#allocation4], 128  }
 0x2e8   :  { %725 = vsyncadd [#allocation4], 4294967168 }
 0x2e9   :  { %485 = vsyncpa [#allocation3], 1 }
 0x2ea   :  { %486 = vsyncpa [#allocation6], 1 }
 0x2eb   :  { %487 = vsyncpa [#allocation9], 1 }
 0x2ec   :  { %488 = vsyncpa [#allocation4], 1 }

</bundles_post_ra>
